<compile_context>
chip_gen: v6e
topology: v6e:2x2x1
jax: 0.10.0
libtpu: 0.0.40
codegen_flags: <defaults>
</compile_context>

<pallas_src>
import jax
import jax.numpy as jnp
from jax.experimental import pallas as pl
from jax.experimental.pallas import tpu as pltpu

HIDDEN_SIZE = 64


def _qnet_kernel(x_ref, a_ref,
                 ws_pad_ref, wa_pad_ref, b12_ref,
                 w1_ref, b1_ref,
                 w2_ref, b2_ref,
                 out_ref):
    f32 = jnp.float32
    cd = ws_pad_ref.dtype  # MXU feed dtype (bf16 by default, f32 optional)

    # Fused, lane-dense first layer (128 output lanes):
    #   cols 0..63   <- x @ Ws (+ bs)
    #   cols 64..127 <- a @ Wa (+ ba)
    # x/a are cast to the MXU dtype here (VPU op, hidden under the input DMA).
    acc12 = (jnp.dot(x_ref[...].astype(cd), ws_pad_ref[...],
                     preferred_element_type=f32)
             + jnp.dot(a_ref[...].astype(cd), wa_pad_ref[...],
                       preferred_element_type=f32)
             + b12_ref[...])
    # ReLU in f32 (safe on v5e); re-feed the MXU in the weight dtype, which
    # keeps the [TB,128] intermediate in bf16 on v6e/v7x configurations.
    h12 = jnp.maximum(acc12, 0.0).astype(w1_ref.dtype)

    # fc1: single K=128 matmul over the fused features -> [TB, 64] (f32 acc).
    h = jnp.maximum(
        jnp.dot(h12, w1_ref[...], preferred_element_type=f32) + b1_ref[...],
        0.0)

    # fc2 (N=1): VPU multiply + XLU lane reduction instead of a 1-wide matmul.
    q = jnp.sum(h * w2_ref[...], axis=-1, keepdims=True) + b2_ref[...]
    out_ref[...] = q.astype(out_ref.dtype)


def _resident_spec(arr):
    """Full-array block, constant index -> stays resident in VMEM."""
    n = arr.ndim
    return pl.BlockSpec(arr.shape, lambda i, _n=n: (0,) * _n)


def _round_up(v, m):
    return ((v + m - 1) // m) * m


def _num_tensorcores():
    """2 on v7x (2 TensorCores/chip), 1 on v5e/v6e (and on failure)."""
    try:
        kind = jax.devices()[0].device_kind.lower()
        if "v7" in kind:
            return 2
    except Exception:
        pass
    return 1


def prepare_params(params, compute_dtype=jnp.bfloat16):
    """One-time weight preprocessing, hoisted out of the per-call path.

    params: (ws, bs, wa, ba, w1, b1, w2, b2) with weights as
    [in_features, out_features] and biases as [1, out_features].
    Returns the pytree consumed by qnetwork_forward.
    """
    ws, bs, wa, ba, w1, b1, w2, b2 = params
    H = HIDDEN_SIZE
    state_dim = ws.shape[0]
    action_dim = wa.shape[0]
    cd = compute_dtype

    # Zero-padded, lane-dense first-layer weights (one 128-wide output).
    ws_pad = jnp.zeros((state_dim, 2 * H), jnp.float32).at[:, :H].set(ws).astype(cd)
    wa_pad = jnp.zeros((action_dim, 2 * H), jnp.float32).at[:, H:].set(wa).astype(cd)
    b12 = jnp.concatenate([bs, ba], axis=-1).astype(jnp.float32)   # [1, 128]

    w1_c = w1.astype(cd)                                           # [128, 64]
    b1_c = b1.astype(jnp.float32)                                  # [1, 64]
    w2_row = w2.reshape(1, H).astype(jnp.float32)                  # [1, 64]
    b2_c = b2.reshape(1, 1).astype(jnp.float32)                    # [1, 1]
    return (ws_pad, wa_pad, b12, w1_c, b1_c, w2_row, b2_c)


def qnetwork_forward(x, a, prepared_params, *, block_b=1024):
    """x: [B, state_dim] f32, a: [B, action_dim] f32 -> q: [B, 1] f32.

    prepared_params: output of prepare_params() (preprocessed once, reused).
    """
    B, state_dim = x.shape
    action_dim = a.shape[1]
    H = HIDDEN_SIZE
    cd = prepared_params[0].dtype
    isz = jnp.dtype(cd).itemsize

    # --- batch tile selection -------------------------------------------
    TB = int(min(block_b, B))
    if TB < B:
        TB = max(16, TB - (TB % 16))           # mult of 16: bf16 sublane packing
    ncores = _num_tensorcores()
    if ncores > 1 and B >= 32:
        # v7x: make sure the "parallel" batch axis yields >= 2 blocks.
        TB = min(TB, _round_up(pl.cdiv(B, ncores), 16))
    grid = (pl.cdiv(B, TB),)

    def batch_spec(d):
        return pl.BlockSpec((TB, d), lambda i: (i, 0))

    in_specs = ([batch_spec(state_dim), batch_spec(action_dim)]
                + [_resident_spec(p) for p in prepared_params])
    # Output stays [B, 1] (last dim == full array dim -> legal block).  A
    # lane-dense output slab is not worth it at ~4 B/row of writeback.
    out_specs = pl.BlockSpec((TB, 1), lambda i: (i, 0))

    # --- VMEM budget: double-buffered tiles + resident weights + intermediates
    H2 = 2 * H
    est = (2 * TB * (state_dim + action_dim) * 4        # pipelined f32 x/a tiles
           + 2 * TB * 1 * 4                             # pipelined output tile
           + (state_dim + action_dim) * H2 * isz        # padded fused-layer weights
           + H2 * H * isz                               # w1
           + (H2 + 2 * H + 1) * 4                       # biases + w2 row (f32)
           + TB * H2 * 4                                # acc12 (f32)
           + TB * H2 * isz                              # h12 (cd)
           + TB * H * 4)                                # h (f32)
    vmem_limit = int(min(32 * 1024 * 1024, max(4 * 1024 * 1024, 2 * est)))

    return pl.pallas_call(
        _qnet_kernel,
        out_shape=jax.ShapeDtypeStruct((B, 1), jnp.float32),
        grid=grid,
        in_specs=in_specs,
        out_specs=out_specs,
        compiler_params=pltpu.CompilerParams(
            dimension_semantics=("parallel",),
            vmem_limit_bytes=vmem_limit),
    )(x, a, *prepared_params)


def init_params(key, state_dim, action_dim):
    """nn.Linear-style init (uniform +/- 1/sqrt(fan_in)); weights as [in, out]."""
    def linear(k, fan_in, fan_out):
        kw, kb = jax.random.split(k)
        bound = 1.0 / jnp.sqrt(fan_in)
        w = jax.random.uniform(kw, (fan_in, fan_out), jnp.float32, -bound, bound)
        b = jax.random.uniform(kb, (1, fan_out), jnp.float32, -bound, bound)
        return w, b

    k1, k2, k3, k4 = jax.random.split(key, 4)
    ws, bs = linear(k1, state_dim, HIDDEN_SIZE)
    wa, ba = linear(k2, action_dim, HIDDEN_SIZE)
    w1, b1 = linear(k3, HIDDEN_SIZE * 2, HIDDEN_SIZE)
    w2, b2 = linear(k4, HIDDEN_SIZE, 1)
    return (ws, bs, wa, ba, w1, b1, w2, b2)


def reference_forward(x, a, params):
    ws, bs, wa, ba, w1, b1, w2, b2 = params
    h1 = jax.nn.relu(x @ ws + bs)
    h2 = jax.nn.relu(a @ wa + ba)
    h = jax.nn.relu(jnp.concatenate([h1, h2], axis=-1) @ w1 + b1)
    return h @ w2 + b2


if __name__ == "__main__":
    key = jax.random.PRNGKey(0)
    kx, ka, kp = jax.random.split(key, 3)

    state_dim, action_dim = 8, 4
    params = init_params(kp, state_dim, action_dim)

    # Weight preprocessing hoisted out of the per-call path (done once).
    prepared_f32 = prepare_params(params, compute_dtype=jnp.float32)
    prepared_bf16 = prepare_params(params, compute_dtype=jnp.bfloat16)

    # Small batch (single grid step), exact-semantics f32 path.
    B_small = 8
    x_s = jax.random.normal(kx, (B_small, state_dim), jnp.float32)
    a_s = jax.random.normal(ka, (B_small, action_dim), jnp.float32)

    q_f32 = jax.block_until_ready(qnetwork_forward(x_s, a_s, prepared_f32))
    q_ref = reference_forward(x_s, a_s, params)
    assert q_f32.shape == (B_small, 1)
    assert jnp.allclose(q_f32, q_ref, atol=1e-5, rtol=1e-5)

    # Default bf16-fed MXU path (looser tolerance vs. the f32 reference).
    q_bf16 = jax.block_until_ready(qnetwork_forward(x_s, a_s, prepared_bf16))
    assert q_bf16.shape == (B_small, 1)
    assert jnp.allclose(q_bf16, q_ref, atol=5e-2, rtol=5e-2)

    # Larger batch exercising the batch-tiled grid.
    B_big = 1024
    kx2, ka2 = jax.random.split(jax.random.PRNGKey(1))
    x_b = jax.random.normal(kx2, (B_big, state_dim), jnp.float32)
    a_b = jax.random.normal(ka2, (B_big, action_dim), jnp.float32)
    q_big = jax.block_until_ready(qnetwork_forward(x_b, a_b, prepared_f32))
    q_big_ref = reference_forward(x_b, a_b, params)
    assert q_big.shape == (B_big, 1)
    assert jnp.allclose(q_big, q_big_ref, atol=1e-4, rtol=1e-4)

    # Non-divisible batch: exercises the trailing partial block / masked store.
    B_odd = 1000
    kx3, ka3 = jax.random.split(jax.random.PRNGKey(2))
    x_o = jax.random.normal(kx3, (B_odd, state_dim), jnp.float32)
    a_o = jax.random.normal(ka3, (B_odd, action_dim), jnp.float32)
    q_odd = jax.block_until_ready(
        qnetwork_forward(x_o, a_o, prepared_f32, block_b=512))
    q_odd_ref = reference_forward(x_o, a_o, params)
    assert q_odd.shape == (B_odd, 1)
    assert jnp.allclose(q_odd, q_odd_ref, atol=1e-4, rtol=1e-4)

    print("KERNEL_OK")
</pallas_src>

<mosaic_0001>
module attributes {stable_mosaic.version = 11 : i64} {
  func.func @_qnet_kernel(%arg0: i32, %arg1: memref<8x8xf32, #tpu.memory_space<vmem>>, %arg2: memref<8x4xf32, #tpu.memory_space<vmem>>, %arg3: memref<8x128xf32, #tpu.memory_space<vmem>>, %arg4: memref<4x128xf32, #tpu.memory_space<vmem>>, %arg5: memref<1x128xf32, #tpu.memory_space<vmem>>, %arg6: memref<128x64xf32, #tpu.memory_space<vmem>>, %arg7: memref<1x64xf32, #tpu.memory_space<vmem>>, %arg8: memref<1x64xf32, #tpu.memory_space<vmem>>, %arg9: memref<1x1xf32, #tpu.memory_space<vmem>>, %arg10: memref<8x1xf32, #tpu.memory_space<vmem>>) attributes {dimension_semantics = [#tpu.dimension_semantics<parallel>], iteration_bounds = array<i64: 1>, scalar_prefetch = 0 : i64, scratch_operands = 0 : i64, tpu.core_type = #tpu.core_type<tc>, window_params = [{transform_indices = @transform_0, window_bounds = array<i64: 8, 8>}, {transform_indices = @transform_1, window_bounds = array<i64: 8, 4>}, {pipeline_mode = #tpu.pipeline_mode<synchronous>, transform_indices = @transform_2, window_bounds = array<i64: 8, 128>}, {pipeline_mode = #tpu.pipeline_mode<synchronous>, transform_indices = @transform_3, window_bounds = array<i64: 4, 128>}, {pipeline_mode = #tpu.pipeline_mode<synchronous>, transform_indices = @transform_4, window_bounds = array<i64: 1, 128>}, {pipeline_mode = #tpu.pipeline_mode<synchronous>, transform_indices = @transform_5, window_bounds = array<i64: 128, 64>}, {pipeline_mode = #tpu.pipeline_mode<synchronous>, transform_indices = @transform_6, window_bounds = array<i64: 1, 64>}, {pipeline_mode = #tpu.pipeline_mode<synchronous>, transform_indices = @transform_7, window_bounds = array<i64: 1, 64>}, {pipeline_mode = #tpu.pipeline_mode<synchronous>, transform_indices = @transform_8, window_bounds = array<i64: 1, 1>}, {transform_indices = @transform_9, window_bounds = array<i64: 8, 1>}]} {
    %c0 = arith.constant 0 : index
    %c0_0 = arith.constant 0 : index
    %0 = vector.load %arg1[%c0, %c0_0] : memref<8x8xf32, #tpu.memory_space<vmem>>, vector<8x8xf32>
    %c0_1 = arith.constant 0 : index
    %c0_2 = arith.constant 0 : index
    %1 = vector.load %arg3[%c0_1, %c0_2] : memref<8x128xf32, #tpu.memory_space<vmem>>, vector<8x128xf32>
    %cst = arith.constant dense<0.000000e+00> : vector<8x128xf32>
    %2 = tpu.matmul %0, %1, %cst {dimension_numbers = #tpu.dot_dimension_numbers<[1], [0], [0], [1], [0, 0, 1, 1], [], []>} : vector<8x8xf32>, vector<8x128xf32>, vector<8x128xf32> -> vector<8x128xf32>
    %c0_3 = arith.constant 0 : index
    %c0_4 = arith.constant 0 : index
    %3 = vector.load %arg2[%c0_3, %c0_4] : memref<8x4xf32, #tpu.memory_space<vmem>>, vector<8x4xf32>
    %c0_5 = arith.constant 0 : index
    %c0_6 = arith.constant 0 : index
    %4 = vector.load %arg4[%c0_5, %c0_6] : memref<4x128xf32, #tpu.memory_space<vmem>>, vector<4x128xf32>
    %cst_7 = arith.constant dense<0.000000e+00> : vector<8x128xf32>
    %5 = tpu.matmul %3, %4, %cst_7 {dimension_numbers = #tpu.dot_dimension_numbers<[1], [0], [0], [1], [0, 0, 1, 1], [], []>} : vector<8x4xf32>, vector<4x128xf32>, vector<8x128xf32> -> vector<8x128xf32>
    %6 = arith.addf %2, %5 : vector<8x128xf32>
    %c0_8 = arith.constant 0 : index
    %c0_9 = arith.constant 0 : index
    %7 = vector.load %arg5[%c0_8, %c0_9] : memref<1x128xf32, #tpu.memory_space<vmem>>, vector<1x128xf32>
    %8 = vector.broadcast %7 : vector<1x128xf32> to vector<8x128xf32>
    %9 = arith.addf %6, %8 : vector<8x128xf32>
    %cst_10 = arith.constant 0.000000e+00 : f32
    %10 = vector.broadcast %cst_10 : f32 to vector<8x128xf32>
    %11 = arith.maximumf %9, %10 : vector<8x128xf32>
    %c0_11 = arith.constant 0 : index
    %c0_12 = arith.constant 0 : index
    %12 = vector.load %arg6[%c0_11, %c0_12] : memref<128x64xf32, #tpu.memory_space<vmem>>, vector<128x64xf32>
    %cst_13 = arith.constant dense<0.000000e+00> : vector<8x64xf32>
    %13 = tpu.matmul %11, %12, %cst_13 {dimension_numbers = #tpu.dot_dimension_numbers<[1], [0], [0], [1], [0, 0, 1, 1], [], []>} : vector<8x128xf32>, vector<128x64xf32>, vector<8x64xf32> -> vector<8x64xf32>
    %c0_14 = arith.constant 0 : index
    %c0_15 = arith.constant 0 : index
    %14 = vector.load %arg7[%c0_14, %c0_15] : memref<1x64xf32, #tpu.memory_space<vmem>>, vector<1x64xf32>
    %15 = vector.broadcast %14 : vector<1x64xf32> to vector<8x64xf32>
    %16 = arith.addf %13, %15 : vector<8x64xf32>
    %cst_16 = arith.constant 0.000000e+00 : f32
    %17 = vector.broadcast %cst_16 : f32 to vector<8x64xf32>
    %18 = arith.maximumf %16, %17 : vector<8x64xf32>
    %c0_17 = arith.constant 0 : index
    %c0_18 = arith.constant 0 : index
    %19 = vector.load %arg8[%c0_17, %c0_18] : memref<1x64xf32, #tpu.memory_space<vmem>>, vector<1x64xf32>
    %20 = vector.broadcast %19 : vector<1x64xf32> to vector<8x64xf32>
    %21 = arith.mulf %18, %20 : vector<8x64xf32>
    %cst_19 = arith.constant dense<0.000000e+00> : vector<8xf32>
    %22 = vector.multi_reduction <add>, %21, %cst_19 [1] : vector<8x64xf32> to vector<8xf32>
    %23 = vector.shape_cast %22 : vector<8xf32> to vector<8x1xf32>
    %c0_20 = arith.constant 0 : index
    %c0_21 = arith.constant 0 : index
    %24 = vector.load %arg9[%c0_20, %c0_21] : memref<1x1xf32, #tpu.memory_space<vmem>>, vector<1x1xf32>
    %25 = vector.broadcast %24 : vector<1x1xf32> to vector<8x1xf32>
    %26 = arith.addf %23, %25 : vector<8x1xf32>
    %c0_22 = arith.constant 0 : index
    %c0_23 = arith.constant 0 : index
    %27 = vector.load %arg10[%c0_22, %c0_23] : memref<8x1xf32, #tpu.memory_space<vmem>>, vector<8x1xf32>
    tpu.vector_store %arg10[%c0_22, %c0_23], %26 {strides = array<i32>} : memref<8x1xf32, #tpu.memory_space<vmem>>, vector<8x1xf32>,
    return
  }
  func.func @transform_0(%arg0: i32) -> (i32, i32) {
    %c0_i32 = arith.constant 0 : i32
    %c0_i32_0 = arith.constant 0 : i32
    return %arg0, %c0_i32 : i32, i32
  }
  func.func @transform_1(%arg0: i32) -> (i32, i32) {
    %c0_i32 = arith.constant 0 : i32
    %c0_i32_0 = arith.constant 0 : i32
    return %arg0, %c0_i32 : i32, i32
  }
  func.func @transform_2(%arg0: i32) -> (i32, i32) {
    %c0_i32 = arith.constant 0 : i32
    %c0_i32_0 = arith.constant 0 : i32
    %c0_i32_1 = arith.constant 0 : i32
    return %c0_i32, %c0_i32_0 : i32, i32
  }
  func.func @transform_3(%arg0: i32) -> (i32, i32) {
    %c0_i32 = arith.constant 0 : i32
    %c0_i32_0 = arith.constant 0 : i32
    %c0_i32_1 = arith.constant 0 : i32
    return %c0_i32, %c0_i32_0 : i32, i32
  }
  func.func @transform_4(%arg0: i32) -> (i32, i32) {
    %c0_i32 = arith.constant 0 : i32
    %c0_i32_0 = arith.constant 0 : i32
    %c0_i32_1 = arith.constant 0 : i32
    return %c0_i32, %c0_i32_0 : i32, i32
  }
  func.func @transform_5(%arg0: i32) -> (i32, i32) {
    %c0_i32 = arith.constant 0 : i32
    %c0_i32_0 = arith.constant 0 : i32
    %c0_i32_1 = arith.constant 0 : i32
    return %c0_i32, %c0_i32_0 : i32, i32
  }
  func.func @transform_6(%arg0: i32) -> (i32, i32) {
    %c0_i32 = arith.constant 0 : i32
    %c0_i32_0 = arith.constant 0 : i32
    %c0_i32_1 = arith.constant 0 : i32
    return %c0_i32, %c0_i32_0 : i32, i32
  }
  func.func @transform_7(%arg0: i32) -> (i32, i32) {
    %c0_i32 = arith.constant 0 : i32
    %c0_i32_0 = arith.constant 0 : i32
    %c0_i32_1 = arith.constant 0 : i32
    return %c0_i32, %c0_i32_0 : i32, i32
  }
  func.func @transform_8(%arg0: i32) -> (i32, i32) {
    %c0_i32 = arith.constant 0 : i32
    %c0_i32_0 = arith.constant 0 : i32
    %c0_i32_1 = arith.constant 0 : i32
    return %c0_i32, %c0_i32_0 : i32, i32
  }
  func.func @transform_9(%arg0: i32) -> (i32, i32) {
    %c0_i32 = arith.constant 0 : i32
    %c0_i32_0 = arith.constant 0 : i32
    return %arg0, %c0_i32 : i32, i32
  }
}

</mosaic_0001>

<bundles_post_ra>
// kernel: tpu_custom_call.1
= control target key start
LH: loop header
LB: loop body
LE: loop exit
PB: predicated region body
PF: predicated region fallthrough
CT: control target
= control target key end

     0   :  { %vm42_vm0 = vcmask 1043456   ;;  %vm38_vm1 = vcmask 31744   ;;  %v394_v0 = vmov 0.0   ;;  %vm395_vm2 = vmmov 0   ;;  %s524_s3 = inlined_call_operand.vmem [shape: f32[4,128], index: 3, kind: input, shape index: {}]   ;;  %s525_s1 = inlined_call_operand.vmem [shape: f32[8,4], index: 1, kind: input, shape index: {}]   ;;  %s526_s2 = inlined_call_operand.vmem [shape: f32[8,128], index: 2, kind: input, shape index: {}]   ;;  %s527_s5 = inlined_call_operand.vmem [shape: f32[128,64], index: 5, kind: input, shape index: {}]   ;;  %s528_s0 = inlined_call_operand.vmem [shape: f32[8,8], index: 0, kind: input, shape index: {}]   ;;  %s529_s4 = inlined_call_operand.vmem [shape: f32[1,128], index: 4, kind: input, shape index: {}]   ;;  %s530_s8 = inlined_call_operand.<no memory space> [shape: f32[1,1], index: 8, kind: input, shape index: {}]   ;;  %s531_s6 = inlined_call_operand.vmem [shape: f32[1,64], index: 6, kind: input, shape index: {}]   ;;  %s532_s7 = inlined_call_operand.vmem [shape: f32[1,64], index: 7, kind: input, shape index: {}]   ;;  %s533_s9 = inlined_call_operand.vmem [shape: f32[8,1], index: 9, kind: output, shape index: {}]  }
   0x1   :  { %347 = vmatprep.subr.mxu1 %v394_v0  ;;  %v37_v1 = vld [vmem:[%s524_s3] sm:$0xf]  ;;  %349 = vmatprep.mubr.msk.f32.mxu1 %vm395_vm2, %v394_v0  ;;  %v214_v4 = vld [vmem:[%s527_s5 + $0x78] sm:$0xff]  ;;  %vm116_vm3 = vcmask 64512   ;;  %v213_v6 = vld [vmem:[%s527_s5 + $0x70] sm:$0xff]  ;;  %v14_v29 = vstv %s530_s8  ;;  %vm301_vm4 = vcmask 523264  }
   0x2   :  { %v36_v2 = vld [vmem:[%s525_s1] sm:$0xff]  ;;  %348 = vmatpush3.msk.msra.mxu1 %vm42_vm0, %v37_v1  ;;  %357 = vmatprep.subr.mxu0 %v394_v0  ;;  %v212_v7 = vld [vmem:[%s527_s5 + $0x68] sm:$0xff]  ;;  %v210_v9 = vld [vmem:[%s527_s5 + $0x58] sm:$0xff]  ;;  %15 = vst [vmem:[#allocation2] sm:$0x1] %v14_v29  ;;  %vm313_vm5 = vcmask 7168  }
   0x3   :  { %v35_v3 = vld [vmem:[%s526_s2] sm:$0xff]  ;;  %350 = vmatmul.mubr.msk.f32.vlgmr.msra.gmra.mxu1 %vm38_vm1, %v36_v2  ;;  %352 = vmatprep.subr.mxu1 %v394_v0  ;;  %v209_v10 = vld [vmem:[%s527_s5 + $0x50] sm:$0xff]  ;;  %v208_v11 = vld [vmem:[%s527_s5 + $0x48] sm:$0xff] }
   0x4   :  { %353 = vmatpush3.msra.mxu1 %v35_v3  ;;  %354 = vmatprep.mubr.msk.f32.mxu1 %vm395_vm2, %v394_v0  ;;  %v34_v5 = vld [vmem:[%s528_s0] sm:$0xff]  ;;  %v206_v13 = vld [vmem:[%s527_s5 + $0x38] sm:$0xff]  ;;  %v205_v14 = vld [vmem:[%s527_s5 + $0x30] sm:$0xff] }
   0x5   :  { %358 = vmatpush3.msra.mxu0 %v214_v4  ;;  %389 = vmatprep.mubr.msk.f32.mxu0 %vm395_vm2, %v394_v0  ;;  %v211_v8 = vld [vmem:[%s527_s5 + $0x60] sm:$0xff]  ;;  %v204_v15 = vld [vmem:[%s527_s5 + $0x28] sm:$0xff]  ;;  %v202_v17 = vld [vmem:[%s527_s5 + $0x18] sm:$0xff] }
   0x6   :  { %359 = vmatprep.subr.mxu0 %v394_v0  ;;  %v207_v12 = vld [vmem:[%s527_s5 + $0x40] sm:$0xff]  ;;  %v201_v18 = vld [vmem:[%s527_s5 + $0x10] sm:$0xff]  ;;  %v200_v19 = vld [vmem:[%s527_s5 + $0x8] sm:$0xff] }
   0x7   :  { %355 = vmatmul.mubr.msk.f32.vlgmr.msra.gmra.mxu1 %vm116_vm3, %v34_v5  ;;  %360 = vmatpush3.msra.mxu0 %v213_v6  ;;  %v203_v16 = vld [vmem:[%s527_s5 + $0x20] sm:$0xff] }
   0x8   :  { %361 = vmatprep.subr.mxu0 %v394_v0  ;;  %v199_v20 = vld [vmem:[%s527_s5] sm:$0xff] }
   0x9   :  { %362 = vmatpush3.msra.mxu0 %v212_v7  ;;  %v322_v24 = vld [vmem:[%s529_s4] ss:$0 sm:$0xff] }
   0xa   :  { %363 = vmatprep.subr.mxu0 %v394_v0  ;;  %v323_v30 = vld [vmem:[%s531_s6] ss:$0 sm:$0xff] }
   0xb   :  { %364 = vmatpush3.msra.mxu0 %v211_v8  ;;  %v324_v34 = vld [vmem:[%s532_s7] ss:$0 sm:$0xff] }
   0xc   :  { %365 = vmatprep.subr.mxu0 %v394_v0  ;;  %v325_v38 = vld [vmem:[#allocation2] ss:$0 sm:$0xff] }
   0xd   :  { %366 = vmatpush3.msra.mxu0 %v210_v9 }
   0xe   :  { %367 = vmatprep.subr.mxu0 %v394_v0 }
   0xf   :  { %368 = vmatpush3.msra.mxu0 %v209_v10 }
  0x10   :  { %369 = vmatprep.subr.mxu0 %v394_v0 }
  0x11   :  { %370 = vmatpush3.msra.mxu0 %v208_v11 }
  0x12   :  { %371 = vmatprep.subr.mxu0 %v394_v0 }
  0x13   :  { %372 = vmatpush3.msra.mxu0 %v207_v12 }
  0x14   :  { %373 = vmatprep.subr.mxu0 %v394_v0 }
  0x15   :  { %374 = vmatpush3.msra.mxu0 %v206_v13 }
  0x16   :  { %375 = vmatprep.subr.mxu0 %v394_v0 }
  0x17   :  { %376 = vmatpush3.msra.mxu0 %v205_v14 }
  0x18   :  { %377 = vmatprep.subr.mxu0 %v394_v0 }
  0x19   :  { %378 = vmatpush3.msra.mxu0 %v204_v15 }
  0x1a   :  { %379 = vmatprep.subr.mxu0 %v394_v0 }
  0x1b   :  { %380 = vmatpush3.msra.mxu0 %v203_v16 }
  0x1c   :  { %381 = vmatprep.subr.mxu0 %v394_v0 }
  0x1d   :  { %382 = vmatpush3.msra.mxu0 %v202_v17 }
  0x1e   :  { %383 = vmatprep.subr.mxu0 %v394_v0 }
  0x1f   :  { %384 = vmatpush3.msra.mxu0 %v201_v18 }
  0x20   :  { %385 = vmatprep.subr.mxu0 %v394_v0 }
  0x21   :  { %386 = vmatpush3.msra.mxu0 %v200_v19 }
  0x22   :  { %387 = vmatprep.subr.mxu0 %v394_v0 }
  0x23   :  { %388 = vmatpush3.msra.mxu0 %v199_v20 }
  0xc3   :  { %v112_v21 = vpop.f32.mrf.mxu1 }
  0xc5   :  { %v351_v22 = vpop.f32.mrf.mxu1 }
  0xc7   :  { %v186_v23 = vpop.f32.mrf.mxu1 }
  0xc8   :  { %v187_v25 = vadd.f32 %v186_v23, %v112_v21 }
  0xc9   :  { %v356_v26 = vpop.f32.mrf.mxu1 }
  0xca   :  { %v197_v27 = vadd.f32 %v322_v24, %v187_v25 }
  0xcc   :  { %v198_v28 = vmax.f32 %v197_v27, 0.0 }
  0xce   :  { %390 = vmatmul.mubr.f32.vlgmr.msra.gmra.mxu0 %v198_v28 }
 0x18e   :  { %v288_v31 = vpop.f32.mrf.mxu0 }
 0x18f   :  { %v289_v32 = vadd.f32 %v323_v30, %v288_v31 }
 0x190   :  { %v391_v33 = vpop.f32.mrf.mxu0 }
 0x191   :  { %v292_v35 = vmax.f32 %v289_v32, 0.0 }
 0x193   :  { %v300_v36 = vmul.f32 %v324_v34, %v292_v35 }
 0x195   :  { %v302_v37 = vsel %vm301_vm4, %v300_v36, 0.0 }
 0x196   :  { %303 = vadd.xlane.f32.xlu0 %v302_v37 }
 0x21f   :  { %v304_v39 = vpop.xlane.xlu0 %303 }
 0x220   :  { %v312_v40 = vadd.f32 %v325_v38, %v304_v39 }
 0x222   :  { %314 = vst.msk [vmem:[%s533_s9] sm:$0xff] %vm313_vm5, %v312_v40 }

</bundles_post_ra>
